<compile_context>
chip_gen: v6e
topology: v6e:2x2x1
jax: 0.10.0
libtpu: 0.0.40
codegen_flags: <defaults>
</compile_context>

<pallas_src>
import functools

import jax
import jax.numpy as jnp
from jax.experimental import pallas as pl
from jax.experimental.pallas import tpu as pltpu


def _round_up(x, m):
    return (x + m - 1) // m * m


def _mlp_kernel(x_ref, w1_ref, b1_ref, w2_ref, b2_ref, o_ref, *, activation):
    # Layer 1: [TILE_B, D_p] @ [D_p, H_p] on the MXU, f32 accumulation.
    h = jnp.dot(x_ref[...], w1_ref[...], preferred_element_type=jnp.float32)
    # Bias-add + activation in f32 (VPU/EUP; v5e has no bf16 VPU path).
    h = activation(h + b1_ref[...])
    # Layer 2: [TILE_B, H_p] @ [H_p, O_p]; cast h to the weight dtype so bf16
    # weights use the fast MXU path. Padded hidden cols are harmless: the
    # corresponding W2 rows are zero.
    out = jnp.dot(h.astype(w2_ref.dtype), w2_ref[...],
                  preferred_element_type=jnp.float32)
    o_ref[...] = (out + b2_ref[...]).astype(o_ref.dtype)


def mlp_forward(x, w1, b1, w2, b2, activation=jax.nn.relu,
                compute_dtype=jnp.float32, tile_b=256):
    """Forward pass of MLPModel.

    x:  [B, 784] float32
    w1: [784, H] float32 (transposed vs torch's [H, 784])
    b1: [H]      float32
    w2: [H, 10]  float32 (transposed vs torch's [10, H])
    b2: [10]     float32
    returns [B, 10] float32
    """
    B, D = x.shape
    H = w1.shape[1]
    O = w2.shape[1]

    # ---- Lane-align every feature dimension (multiples of 128). ----
    D_p = _round_up(D, 128)   # 784 -> 896
    H_p = _round_up(H, 128)   # e.g. 32 -> 128
    O_p = _round_up(O, 128)   # 10 -> 128

    # ---- Pick a batch tile (multiple of 8 sublanes, big when B allows). ----
    tile_b = _round_up(max(tile_b, 8), 8)
    TILE_B = min(tile_b, _round_up(B, 8))
    B_p = _round_up(B, TILE_B)
    num_tiles = B_p // TILE_B

    # ---- Zero-pad operands (zero pads cancel exactly in the matmuls). ----
    x_p = jnp.zeros((B_p, D_p), jnp.float32).at[:B, :D].set(x)
    w1_p = jnp.zeros((D_p, H_p), jnp.float32).at[:D, :H].set(w1)
    b1_p = jnp.zeros((1, H_p), jnp.float32).at[0, :H].set(b1)
    w2_p = jnp.zeros((H_p, O_p), jnp.float32).at[:H, :O].set(w2)
    b2_p = jnp.zeros((1, O_p), jnp.float32).at[0, :O].set(b2)

    # Optional bf16 compute path (v6e / v7x): halve MXU / HBM cost for the
    # matmul operands; accumulation stays f32, biases + activation stay f32.
    x_p = x_p.astype(compute_dtype)
    w1_p = w1_p.astype(compute_dtype)
    w2_p = w2_p.astype(compute_dtype)

    # TODO(synk): for very large swept H (>=4096) on v7x, add an H-tiled grid
    # axis with a VMEM f32 accumulator (pl.when init/finalize) so the resident
    # W1 stays inside v7x's 64 MiB VMEM.

    kernel = functools.partial(_mlp_kernel, activation=activation)

    flops = 2 * B_p * D_p * H_p + 2 * B_p * H_p * O_p
    itemsize = jnp.dtype(compute_dtype).itemsize
    bytes_accessed = (x_p.size * itemsize + w1_p.size * itemsize
                      + w2_p.size * itemsize + b1_p.size * 4 + b2_p.size * 4
                      + B_p * O_p * 4)

    out_p = pl.pallas_call(
        kernel,
        out_shape=jax.ShapeDtypeStruct((B_p, O_p), jnp.float32),
        grid=(num_tiles,),
        in_specs=[
            pl.BlockSpec((TILE_B, D_p), lambda i: (i, 0)),   # x: batch-tiled
            pl.BlockSpec((D_p, H_p), lambda i: (0, 0)),      # W1: resident
            pl.BlockSpec((1, H_p), lambda i: (0, 0)),        # b1: resident
            pl.BlockSpec((H_p, O_p), lambda i: (0, 0)),      # W2: resident
            pl.BlockSpec((1, O_p), lambda i: (0, 0)),        # b2: resident
        ],
        out_specs=pl.BlockSpec((TILE_B, O_p), lambda i: (i, 0)),
        compiler_params=pltpu.CompilerParams(
            dimension_semantics=("parallel",),   # shard batch across TCs (v7x)
            vmem_limit_bytes=48 * 1024 * 1024,
        ),
        cost_estimate=pl.CostEstimate(
            flops=flops, transcendentals=0, bytes_accessed=bytes_accessed),
    )(x_p, w1_p, b1_p, w2_p, b2_p)

    # Lane-dense store inside the kernel; slice back to the logical shape here.
    return out_p[:B, :O]


def init_params(key, neuron_size):
    """Deterministic PyTorch-style (uniform +/- 1/sqrt(fan_in)) init."""
    k1, k2, k3, k4 = jax.random.split(key, 4)
    in1, out1 = 784, neuron_size
    in2, out2 = neuron_size, 10
    bound1 = 1.0 / jnp.sqrt(in1)
    bound2 = 1.0 / jnp.sqrt(in2)
    # Stored as [in, out] (transposed relative to torch's [out, in]).
    w1 = jax.random.uniform(k1, (in1, out1), jnp.float32, -bound1, bound1)
    b1 = jax.random.uniform(k2, (out1,), jnp.float32, -bound1, bound1)
    w2 = jax.random.uniform(k3, (in2, out2), jnp.float32, -bound2, bound2)
    b2 = jax.random.uniform(k4, (out2,), jnp.float32, -bound2, bound2)
    return w1, b1, w2, b2


if __name__ == "__main__":
    key = jax.random.PRNGKey(0)
    kx, kp = jax.random.split(key)

    batch = 8
    neuron_size = 32          # hidden width (the swept hyperparameter)
    activation = jax.nn.relu  # activation_f passed to MLPModel

    x = jax.random.normal(kx, (batch, 784), jnp.float32)
    w1, b1, w2, b2 = init_params(kp, neuron_size)

    # Reference in plain JAX (same semantics as the torch forward).
    ref = jnp.dot(jax.nn.relu(jnp.dot(x, w1) + b1), w2) + b2

    # f32 path: bit-for-bit-ish against the reference.
    out = mlp_forward(x, w1, b1, w2, b2, activation=activation,
                      compute_dtype=jnp.float32)
    out = jax.block_until_ready(out)
    assert out.shape == (batch, 10)
    assert jnp.allclose(out, ref, atol=1e-4, rtol=1e-4)

    # bf16 compute path (v6e/v7x throughput option): looser tolerance.
    out_bf16 = mlp_forward(x, w1, b1, w2, b2, activation=activation,
                           compute_dtype=jnp.bfloat16)
    out_bf16 = jax.block_until_ready(out_bf16)
    assert out_bf16.shape == (batch, 10)
    assert jnp.allclose(out_bf16, ref, atol=5e-2, rtol=5e-2)

    print("KERNEL_OK")
</pallas_src>

<mosaic_0001>
module attributes {stable_mosaic.version = 11 : i64} {
  func.func @_mlp_kernel(%arg0: i32, %arg1: memref<8x896xf32, #tpu.memory_space<vmem>>, %arg2: memref<896x128xf32, #tpu.memory_space<vmem>>, %arg3: memref<1x128xf32, #tpu.memory_space<vmem>>, %arg4: memref<128x128xf32, #tpu.memory_space<vmem>>, %arg5: memref<1x128xf32, #tpu.memory_space<vmem>>, %arg6: memref<8x128xf32, #tpu.memory_space<vmem>>) attributes {dimension_semantics = [#tpu.dimension_semantics<parallel>], iteration_bounds = array<i64: 1>, scalar_prefetch = 0 : i64, scratch_operands = 0 : i64, tpu.core_type = #tpu.core_type<tc>, window_params = [{transform_indices = @transform_0, window_bounds = array<i64: 8, 896>}, {pipeline_mode = #tpu.pipeline_mode<synchronous>, transform_indices = @transform_1, window_bounds = array<i64: 896, 128>}, {pipeline_mode = #tpu.pipeline_mode<synchronous>, transform_indices = @transform_2, window_bounds = array<i64: 1, 128>}, {pipeline_mode = #tpu.pipeline_mode<synchronous>, transform_indices = @transform_3, window_bounds = array<i64: 128, 128>}, {pipeline_mode = #tpu.pipeline_mode<synchronous>, transform_indices = @transform_4, window_bounds = array<i64: 1, 128>}, {transform_indices = @transform_5, window_bounds = array<i64: 8, 128>}]} {
    %c0 = arith.constant 0 : index
    %c0_0 = arith.constant 0 : index
    %0 = vector.load %arg1[%c0, %c0_0] : memref<8x896xf32, #tpu.memory_space<vmem>>, vector<8x896xf32>
    %c0_1 = arith.constant 0 : index
    %c0_2 = arith.constant 0 : index
    %1 = vector.load %arg2[%c0_1, %c0_2] : memref<896x128xf32, #tpu.memory_space<vmem>>, vector<896x128xf32>
    %cst = arith.constant dense<0.000000e+00> : vector<8x128xf32>
    %2 = tpu.matmul %0, %1, %cst {dimension_numbers = #tpu.dot_dimension_numbers<[1], [0], [0], [1], [0, 0, 1, 1], [], []>} : vector<8x896xf32>, vector<896x128xf32>, vector<8x128xf32> -> vector<8x128xf32>
    %c0_3 = arith.constant 0 : index
    %c0_4 = arith.constant 0 : index
    %3 = vector.load %arg3[%c0_3, %c0_4] : memref<1x128xf32, #tpu.memory_space<vmem>>, vector<1x128xf32>
    %4 = vector.broadcast %3 : vector<1x128xf32> to vector<8x128xf32>
    %5 = arith.addf %2, %4 : vector<8x128xf32>
    %cst_5 = arith.constant 0.000000e+00 : f32
    %6 = vector.broadcast %cst_5 : f32 to vector<8x128xf32>
    %7 = arith.maximumf %5, %6 : vector<8x128xf32>
    %c0_6 = arith.constant 0 : index
    %c0_7 = arith.constant 0 : index
    %8 = vector.load %arg4[%c0_6, %c0_7] : memref<128x128xf32, #tpu.memory_space<vmem>>, vector<128x128xf32>
    %cst_8 = arith.constant dense<0.000000e+00> : vector<8x128xf32>
    %9 = tpu.matmul %7, %8, %cst_8 {dimension_numbers = #tpu.dot_dimension_numbers<[1], [0], [0], [1], [0, 0, 1, 1], [], []>} : vector<8x128xf32>, vector<128x128xf32>, vector<8x128xf32> -> vector<8x128xf32>
    %c0_9 = arith.constant 0 : index
    %c0_10 = arith.constant 0 : index
    %10 = vector.load %arg5[%c0_9, %c0_10] : memref<1x128xf32, #tpu.memory_space<vmem>>, vector<1x128xf32>
    %11 = vector.broadcast %10 : vector<1x128xf32> to vector<8x128xf32>
    %12 = arith.addf %9, %11 : vector<8x128xf32>
    %c0_11 = arith.constant 0 : index
    %c0_12 = arith.constant 0 : index
    %13 = vector.load %arg6[%c0_11, %c0_12] : memref<8x128xf32, #tpu.memory_space<vmem>>, vector<8x128xf32>
    tpu.vector_store %arg6[%c0_11, %c0_12], %12 {strides = array<i32>} : memref<8x128xf32, #tpu.memory_space<vmem>>, vector<8x128xf32>,
    return
  }
  func.func @transform_0(%arg0: i32) -> (i32, i32) {
    %c0_i32 = arith.constant 0 : i32
    %c0_i32_0 = arith.constant 0 : i32
    return %arg0, %c0_i32 : i32, i32
  }
  func.func @transform_1(%arg0: i32) -> (i32, i32) {
    %c0_i32 = arith.constant 0 : i32
    %c0_i32_0 = arith.constant 0 : i32
    %c0_i32_1 = arith.constant 0 : i32
    return %c0_i32, %c0_i32_0 : i32, i32
  }
  func.func @transform_2(%arg0: i32) -> (i32, i32) {
    %c0_i32 = arith.constant 0 : i32
    %c0_i32_0 = arith.constant 0 : i32
    %c0_i32_1 = arith.constant 0 : i32
    return %c0_i32, %c0_i32_0 : i32, i32
  }
  func.func @transform_3(%arg0: i32) -> (i32, i32) {
    %c0_i32 = arith.constant 0 : i32
    %c0_i32_0 = arith.constant 0 : i32
    %c0_i32_1 = arith.constant 0 : i32
    return %c0_i32, %c0_i32_0 : i32, i32
  }
  func.func @transform_4(%arg0: i32) -> (i32, i32) {
    %c0_i32 = arith.constant 0 : i32
    %c0_i32_0 = arith.constant 0 : i32
    %c0_i32_1 = arith.constant 0 : i32
    return %c0_i32, %c0_i32_0 : i32, i32
  }
  func.func @transform_5(%arg0: i32) -> (i32, i32) {
    %c0_i32 = arith.constant 0 : i32
    %c0_i32_0 = arith.constant 0 : i32
    return %arg0, %c0_i32 : i32, i32
  }
}

</mosaic_0001>

<bundles_post_ra>
// kernel: tpu_custom_call.1
= control target key start
LH: loop header
LB: loop body
LE: loop exit
PB: predicated region body
PF: predicated region fallthrough
CT: control target
= control target key end

     0   :  { %10 = vsyncpa [#allocation3], 0  ;;  %s972_s0 = inlined_call_operand.hbm [shape: f32[8,896], index: 0, kind: input, shape index: {}]   ;;  %s973_s1 = inlined_call_operand.hbm [shape: f32[896,128], index: 1, kind: input, shape index: {}]   ;;  %s974_s2 = inlined_call_operand.vmem [shape: f32[1,128], index: 2, kind: input, shape index: {}]   ;;  %s975_s3 = inlined_call_operand.hbm [shape: f32[128,128], index: 3, kind: input, shape index: {}]   ;;  %s976_s4 = inlined_call_operand.vmem [shape: f32[1,128], index: 4, kind: input, shape index: {}]   ;;  %s977_s5 = inlined_call_operand.hbm [shape: f32[8,128], index: 5, kind: output, shape index: {}]  }
   0x1   :  { %11 = vsyncpa [#allocation6], 0 }
   0x2   :  { %12 = vsyncpa [#allocation4], 0  ;;  %s882_s18 = smov [#allocation5]  }
   0x3   :  { %s28_s19 = sshll.u32 %s882_s18, 4  ;;  %s29_s19 = int_to_ptr.vmem [resolvable:$true] %s28_s19 }
   0x4   :  { %s804_s20 = scalar_lea.vmem %s29_s19, 14336  ;;  %p809_p1 = scmp.lt.s32.totalorder %s29_s19, %s29_s19 }
   0x5   :  { %p805_p0 = scmp.ne.s32.totalorder %s29_s19, %s804_s20  ;;  %p810_p2 = scmp.lt.s32.totalorder %s804_s20, %s804_s20 }
   0x7   :  { %p811_p3 = por %p810_p2, %p809_p1 }
   0x9   :  { %p812_p4 = pnand %p811_p3, %p805_p0 }
   0xb   :  { %815 = shalt.err (!%p812_p4)
}
   0xc   :  { %s883_s21 = smov 128   ;;  %s884_s22 = smov 8  }
   0xd   :  { %34 = dma.hbm_to_vmem [thread:$0]  %s973_s1, 14336, %s29_s19, [#allocation6], %s883_s21, %s883_s21, %s884_s22  }
   0xe   :  { %s885_s25 = smov [#allocation2]   ;;  %s886_s27 = smov [#allocation7]  }
   0xf   :  { %s19_s26 = sshll.u32 %s885_s25, 4  ;;  %s42_s28 = sshll.u32 %s886_s27, 4  ;;  %s20_s26 = int_to_ptr.vmem [resolvable:$true] %s19_s26  ;;  %s43_s28 = int_to_ptr.vmem [resolvable:$true] %s42_s28 }
  0x10   :  { %s824_s29 = scalar_lea.vmem %s20_s26, 896  ;;  %p829_p6 = scmp.lt.s32.totalorder %s20_s26, %s20_s26 }
  0x11   :  { %p825_p5 = scmp.ne.s32.totalorder %s20_s26, %s824_s29  ;;  %p830_p7 = scmp.lt.s32.totalorder %s824_s29, %s824_s29 }
  0x13   :  { %p831_p8 = por %p830_p7, %p829_p6 }
  0x15   :  { %p832_p9 = pnand %p831_p8, %p825_p5 }
  0x17   :  { %835 = shalt.err (!%p832_p9)
}
  0x18   :  { %22 = dma.hbm_to_vmem [thread:$0]  %s972_s0, 896, %s20_s26, [#allocation3]  }
  0x19   :  { %s844_s7 = scalar_lea.vmem %s43_s28, 2048  ;;  %p849_p11 = scmp.lt.s32.totalorder %s43_s28, %s43_s28 }
  0x1a   :  { %p845_p10 = scmp.ne.s32.totalorder %s43_s28, %s844_s7  ;;  %p850_p12 = scmp.lt.s32.totalorder %s844_s7, %s844_s7 }
  0x1c   :  { %p851_p13 = por %p850_p12, %p849_p11 }
  0x1e   :  { %p852_p0 = pnand %p851_p13, %p845_p10 }
  0x20   :  { %855 = shalt.err (!%p852_p0)
}
  0x21   :  { %48 = dma.hbm_to_vmem [thread:$0]  %s975_s3, 2048, %s43_s28, [#allocation6], %s883_s21, %s883_s21, %s884_s22  }
  0x22   :  { %876 = dma.done.wait [#allocation3], 896  }
  0x23   :  { %877 = vsyncadd [#allocation3], 4294966400 }
  0x24   :  { %878 = dma.done.wait [#allocation6], 16384  }
  0x25   :  { %879 = vsyncadd [#allocation6], 4294950912  ;;  %v98_v0 = vld [vmem:[#allocation5 + $0xf8] sm:$0xff]  ;;  %v97_v2 = vld [vmem:[#allocation5 + $0xf0] sm:$0xff]  ;;  %vm888_vm0 = vmmov 0   ;;  %s889_s11 = smov [#allocation8]  }
  0x26   :  { %v82_v1 = vld [vmem:[#allocation5 + $0x78] sm:$0xff]  ;;  %579 = vmatprep.subr.mxu0 %v98_v0  ;;  %v81_v4 = vld [vmem:[#allocation5 + $0x70] sm:$0xff]  ;;  %v96_v6 = vld [vmem:[#allocation5 + $0xe8] sm:$0xff]  ;;  %s567_s12 = sshll.u32 %s889_s11, 4  ;;  %s568_s12 = int_to_ptr.vmem [resolvable:$true] %s567_s12 }
  0x27   :  { %v130_v3 = vld [vmem:[#allocation5 + $0x1f8] sm:$0xff]  ;;  %580 = vmatpush3.msra.mxu0 %v82_v1  ;;  %v129_v7 = vld [vmem:[#allocation5 + $0x1f0] sm:$0xff]  ;;  %v80_v8 = vld [vmem:[#allocation5 + $0x68] sm:$0xff]  ;;  %p861_p2 = scmp.lt.s32.totalorder %s568_s12, %s568_s12 }
  0x28   :  { %v114_v5 = vld [vmem:[#allocation5 + $0x178] sm:$0xff]  ;;  %614 = vmatprep.subr.mxu1 %v130_v3  ;;  %581 = vmatprep.subr.mxu0 %v97_v2  ;;  %v113_v9 = vld [vmem:[#allocation5 + $0x170] sm:$0xff]  ;;  %v128_v10 = vld [vmem:[#allocation5 + $0x1e8] sm:$0xff] }
  0x29   :  { %615 = vmatpush3.msra.mxu1 %v114_v5  ;;  %582 = vmatpush3.msra.mxu0 %v81_v4  ;;  %v95_v11 = vld [vmem:[#allocation5 + $0xe0] sm:$0xff]  ;;  %v112_v12 = vld [vmem:[#allocation5 + $0x168] sm:$0xff]  ;;  %v94_v15 = vld [vmem:[#allocation5 + $0xd8] sm:$0xff] }
  0x2a   :  { %616 = vmatprep.subr.mxu1 %v129_v7  ;;  %583 = vmatprep.subr.mxu0 %v96_v6  ;;  %v79_v13 = vld [vmem:[#allocation5 + $0x60] sm:$0xff]  ;;  %v78_v17 = vld [vmem:[#allocation5 + $0x58] sm:$0xff]  ;;  %v93_v19 = vld [vmem:[#allocation5 + $0xd0] sm:$0xff] }
  0x2b   :  { %617 = vmatpush3.msra.mxu1 %v113_v9  ;;  %v127_v14 = vld [vmem:[#allocation5 + $0x1e0] sm:$0xff]  ;;  %584 = vmatpush3.msra.mxu0 %v80_v8  ;;  %v126_v18 = vld [vmem:[#allocation5 + $0x1d8] sm:$0xff]  ;;  %v77_v21 = vld [vmem:[#allocation5 + $0x50] sm:$0xff] }
  0x2c   :  { %618 = vmatprep.subr.mxu1 %v128_v10  ;;  %v111_v16 = vld [vmem:[#allocation5 + $0x160] sm:$0xff]  ;;  %585 = vmatprep.subr.mxu0 %v95_v11  ;;  %v110_v20 = vld [vmem:[#allocation5 + $0x158] sm:$0xff]  ;;  %v125_v22 = vld [vmem:[#allocation5 + $0x1d0] sm:$0xff]  ;;  %v887_v11 = vmov 0.0  }
  0x2d   :  { %619 = vmatpush3.msra.mxu1 %v112_v12  ;;  %586 = vmatpush3.msra.mxu0 %v79_v13  ;;  %v92_v23 = vld [vmem:[#allocation5 + $0xc8] sm:$0xff]  ;;  %v109_v24 = vld [vmem:[#allocation5 + $0x150] sm:$0xff]  ;;  %v91_v27 = vld [vmem:[#allocation5 + $0xc0] sm:$0xff] }
  0x2e   :  { %620 = vmatprep.subr.mxu1 %v127_v14  ;;  %587 = vmatprep.subr.mxu0 %v94_v15  ;;  %v76_v25 = vld [vmem:[#allocation5 + $0x48] sm:$0xff]  ;;  %v75_v29 = vld [vmem:[#allocation5 + $0x40] sm:$0xff]  ;;  %v90_v31 = vld [vmem:[#allocation5 + $0xb8] sm:$0xff] }
  0x2f   :  { %621 = vmatpush3.msra.mxu1 %v111_v16  ;;  %588 = vmatpush3.msra.mxu0 %v78_v17  ;;  %v124_v26 = vld [vmem:[#allocation5 + $0x1c8] sm:$0xff]  ;;  %v123_v30 = vld [vmem:[#allocation5 + $0x1c0] sm:$0xff]  ;;  %v74_v33 = vld [vmem:[#allocation5 + $0x38] sm:$0xff] }
  0x30   :  { %622 = vmatprep.subr.mxu1 %v126_v18  ;;  %589 = vmatprep.subr.mxu0 %v93_v19  ;;  %v108_v28 = vld [vmem:[#allocation5 + $0x148] sm:$0xff]  ;;  %v107_v32 = vld [vmem:[#allocation5 + $0x140] sm:$0xff]  ;;  %v122_v34 = vld [vmem:[#allocation5 + $0x1b8] sm:$0xff] }
  0x31   :  { %623 = vmatpush3.msra.mxu1 %v110_v20  ;;  %590 = vmatpush3.msra.mxu0 %v77_v21  ;;  %v89_v35 = vld [vmem:[#allocation5 + $0xb0] sm:$0xff]  ;;  %v106_v36 = vld [vmem:[#allocation5 + $0x138] sm:$0xff]  ;;  %v88_v39 = vld [vmem:[#allocation5 + $0xa8] sm:$0xff] }
  0x32   :  { %624 = vmatprep.subr.mxu1 %v125_v22  ;;  %591 = vmatprep.subr.mxu0 %v92_v23  ;;  %v73_v37 = vld [vmem:[#allocation5 + $0x30] sm:$0xff]  ;;  %v72_v41 = vld [vmem:[#allocation5 + $0x28] sm:$0xff]  ;;  %v87_v43 = vld [vmem:[#allocation5 + $0xa0] sm:$0xff] }
  0x33   :  { %625 = vmatpush3.msra.mxu1 %v109_v24  ;;  %592 = vmatpush3.msra.mxu0 %v76_v25  ;;  %v121_v38 = vld [vmem:[#allocation5 + $0x1b0] sm:$0xff]  ;;  %v120_v42 = vld [vmem:[#allocation5 + $0x1a8] sm:$0xff]  ;;  %v71_v45 = vld [vmem:[#allocation5 + $0x20] sm:$0xff] }
  0x34   :  { %626 = vmatprep.subr.mxu1 %v124_v26  ;;  %593 = vmatprep.subr.mxu0 %v91_v27  ;;  %v105_v40 = vld [vmem:[#allocation5 + $0x130] sm:$0xff]  ;;  %v104_v44 = vld [vmem:[#allocation5 + $0x128] sm:$0xff]  ;;  %v119_v46 = vld [vmem:[#allocation5 + $0x1a0] sm:$0xff] }
  0x35   :  { %627 = vmatpush3.msra.mxu1 %v108_v28  ;;  %594 = vmatpush3.msra.mxu0 %v75_v29  ;;  %v86_v47 = vld [vmem:[#allocation5 + $0x98] sm:$0xff]  ;;  %v103_v48 = vld [vmem:[#allocation5 + $0x120] sm:$0xff]  ;;  %v85_v51 = vld [vmem:[#allocation5 + $0x90] sm:$0xff] }
  0x36   :  { %628 = vmatprep.subr.mxu1 %v123_v30  ;;  %595 = vmatprep.subr.mxu0 %v90_v31  ;;  %v70_v49 = vld [vmem:[#allocation5 + $0x18] sm:$0xff]  ;;  %v69_v53 = vld [vmem:[#allocation5 + $0x10] sm:$0xff]  ;;  %v84_v55 = vld [vmem:[#allocation5 + $0x88] sm:$0xff] }
  0x37   :  { %629 = vmatpush3.msra.mxu1 %v107_v32  ;;  %596 = vmatpush3.msra.mxu0 %v74_v33  ;;  %v118_v50 = vld [vmem:[#allocation5 + $0x198] sm:$0xff]  ;;  %v117_v54 = vld [vmem:[#allocation5 + $0x190] sm:$0xff]  ;;  %v68_v57 = vld [vmem:[#allocation5 + $0x8] sm:$0xff] }
  0x38   :  { %630 = vmatprep.subr.mxu1 %v122_v34  ;;  %597 = vmatprep.subr.mxu0 %v89_v35  ;;  %v102_v52 = vld [vmem:[#allocation5 + $0x118] sm:$0xff]  ;;  %v101_v56 = vld [vmem:[#allocation5 + $0x110] sm:$0xff]  ;;  %v116_v58 = vld [vmem:[#allocation5 + $0x188] sm:$0xff] }
  0x39   :  { %631 = vmatpush3.msra.mxu1 %v106_v36  ;;  %598 = vmatpush3.msra.mxu0 %v73_v37  ;;  %v83_v59 = vld [vmem:[#allocation5 + $0x80] sm:$0xff]  ;;  %v61_v60 = vld [vmem:[#allocation2 + $0x8] sm:$0xff]  ;;  %v100_v62 = vld [vmem:[#allocation5 + $0x108] sm:$0xff] }
  0x3a   :  { %632 = vmatprep.subr.mxu1 %v121_v38  ;;  %599 = vmatprep.subr.mxu0 %v88_v39  ;;  %v67_v61 = vld [vmem:[#allocation5] sm:$0xff]  ;;  %v60_v63 = vld [vmem:[#allocation2] sm:$0xff]  ;;  %v162_v1 = vld [vmem:[#allocation5 + $0x2f8] sm:$0xff] }
  0x3b   :  { %633 = vmatpush3.msra.mxu1 %v105_v40  ;;  %600 = vmatpush3.msra.mxu0 %v72_v41  ;;  %v115_v0 = vld [vmem:[#allocation5 + $0x180] sm:$0xff]  ;;  %v146_v4 = vld [vmem:[#allocation5 + $0x278] sm:$0xff]  ;;  %v161_v6 = vld [vmem:[#allocation5 + $0x2f0] sm:$0xff] }
  0x3c   :  { %634 = vmatprep.subr.mxu1 %v120_v42  ;;  %601 = vmatprep.subr.mxu0 %v87_v43  ;;  %v99_v2 = vld [vmem:[#allocation5 + $0x100] sm:$0xff]  ;;  %v62_v5 = vld [vmem:[#allocation2 + $0x10] sm:$0xff]  ;;  %v145_v7 = vld [vmem:[#allocation5 + $0x270] sm:$0xff] }
  0x3d   :  { %635 = vmatpush3.msra.mxu1 %v104_v44  ;;  %602 = vmatpush3.msra.mxu0 %v71_v45  ;;  %v63_v3 = vld [vmem:[#allocation2 + $0x18] sm:$0xff]  ;;  %v160_v8 = vld [vmem:[#allocation5 + $0x2e8] sm:$0xff]  ;;  %v178_v9 = vld [vmem:[#allocation5 + $0x378] sm:$0xff] }
  0x3e   :  { %636 = vmatprep.subr.mxu1 %v119_v46  ;;  %603 = vmatprep.subr.mxu0 %v86_v47  ;;  %v144_v10 = vld [vmem:[#allocation5 + $0x268] sm:$0xff]  ;;  %v159_v12 = vld [vmem:[#allocation5 + $0x2e0] sm:$0xff]  ;;  %v177_v13 = vld [vmem:[#allocation5 + $0x370] sm:$0xff] }
  0x3f   :  { %637 = vmatpush3.msra.mxu1 %v103_v48  ;;  %604 = vmatpush3.msra.mxu0 %v70_v49  ;;  %v143_v14 = vld [vmem:[#allocation5 + $0x260] sm:$0xff]  ;;  %v158_v15 = vld [vmem:[#allocation5 + $0x2d8] sm:$0xff]  ;;  %v176_v16 = vld [vmem:[#allocation5 + $0x368] sm:$0xff] }
  0x40   :  { %638 = vmatprep.subr.mxu1 %v118_v50  ;;  %605 = vmatprep.subr.mxu0 %v85_v51  ;;  %v142_v17 = vld [vmem:[#allocation5 + $0x258] sm:$0xff]  ;;  %v157_v18 = vld [vmem:[#allocation5 + $0x2d0] sm:$0xff]  ;;  %v175_v19 = vld [vmem:[#allocation5 + $0x360] sm:$0xff] }
  0x41   :  { %639 = vmatpush3.msra.mxu1 %v102_v52  ;;  %606 = vmatpush3.msra.mxu0 %v69_v53  ;;  %v141_v20 = vld [vmem:[#allocation5 + $0x250] sm:$0xff]  ;;  %v156_v21 = vld [vmem:[#allocation5 + $0x2c8] sm:$0xff]  ;;  %v174_v22 = vld [vmem:[#allocation5 + $0x358] sm:$0xff] }
  0x42   :  { %640 = vmatprep.subr.mxu1 %v117_v54  ;;  %607 = vmatprep.subr.mxu0 %v84_v55  ;;  %v140_v23 = vld [vmem:[#allocation5 + $0x248] sm:$0xff]  ;;  %v155_v24 = vld [vmem:[#allocation5 + $0x2c0] sm:$0xff]  ;;  %v173_v25 = vld [vmem:[#allocation5 + $0x350] sm:$0xff] }
  0x43   :  { %641 = vmatpush3.msra.mxu1 %v101_v56  ;;  %608 = vmatpush3.msra.mxu0 %v68_v57  ;;  %v139_v26 = vld [vmem:[#allocation5 + $0x240] sm:$0xff]  ;;  %v154_v27 = vld [vmem:[#allocation5 + $0x2b8] sm:$0xff]  ;;  %v172_v28 = vld [vmem:[#allocation5 + $0x348] sm:$0xff] }
  0x44   :  { %642 = vmatprep.subr.mxu1 %v116_v58  ;;  %609 = vmatprep.subr.mxu0 %v83_v59  ;;  %v138_v29 = vld [vmem:[#allocation5 + $0x238] sm:$0xff]  ;;  %v153_v30 = vld [vmem:[#allocation5 + $0x2b0] sm:$0xff]  ;;  %v171_v31 = vld [vmem:[#allocation5 + $0x340] sm:$0xff] }
  0x45   :  { %250 = vmatprep.mubr.f32.mxu0 %v61_v60  ;;  %610 = vmatpush3.msra.mxu0 %v67_v61  ;;  %v137_v32 = vld [vmem:[#allocation5 + $0x230] sm:$0xff]  ;;  %v152_v33 = vld [vmem:[#allocation5 + $0x2a8] sm:$0xff]  ;;  %v170_v34 = vld [vmem:[#allocation5 + $0x338] sm:$0xff] }
  0x46   :  { %643 = vmatpush3.msra.mxu1 %v100_v62  ;;  %251 = vmatmul.mubr.f32.vlgmr.msra.gmra.mxu0 %v60_v63  ;;  %v136_v35 = vld [vmem:[#allocation5 + $0x228] sm:$0xff]  ;;  %v151_v36 = vld [vmem:[#allocation5 + $0x2a0] sm:$0xff]  ;;  %v169_v37 = vld [vmem:[#allocation5 + $0x330] sm:$0xff] }
  0x47   :  { %644 = vmatprep.subr.mxu1 %v115_v0  ;;  %649 = vmatprep.subr.mxu0 %v162_v1  ;;  %v135_v38 = vld [vmem:[#allocation5 + $0x220] sm:$0xff]  ;;  %v150_v39 = vld [vmem:[#allocation5 + $0x298] sm:$0xff]  ;;  %v168_v40 = vld [vmem:[#allocation5 + $0x328] sm:$0xff] }
  0x48   :  { %645 = vmatpush3.msra.mxu1 %v99_v2  ;;  %320 = vmatprep.mubr.f32.mxu1 %v63_v3  ;;  %v134_v41 = vld [vmem:[#allocation5 + $0x218] sm:$0xff]  ;;  %v149_v42 = vld [vmem:[#allocation5 + $0x290] sm:$0xff]  ;;  %v167_v43 = vld [vmem:[#allocation5 + $0x320] sm:$0xff] }
  0x49   :  { %650 = vmatpush3.msra.mxu0 %v146_v4  ;;  %321 = vmatmul.mubr.f32.vlgmr.msra.gmra.mxu1 %v62_v5  ;;  %v133_v44 = vld [vmem:[#allocation5 + $0x210] sm:$0xff]  ;;  %v148_v45 = vld [vmem:[#allocation5 + $0x288] sm:$0xff]  ;;  %v166_v46 = vld [vmem:[#allocation5 + $0x318] sm:$0xff] }
  0x4a   :  { %651 = vmatprep.subr.mxu0 %v161_v6  ;;  %718 = vmatprep.subr.mxu1 %v887_v11  ;;  %v132_v47 = vld [vmem:[#allocation5 + $0x208] sm:$0xff]  ;;  %v147_v48 = vld [vmem:[#allocation5 + $0x280] sm:$0xff]  ;;  %v65_v49 = vld [vmem:[#allocation2 + $0x28] sm:$0xff] }
  0x4b   :  { %652 = vmatpush3.msra.mxu0 %v145_v7  ;;  %719 = vmatpush3.msra.mxu1 %v178_v9  ;;  %v131_v50 = vld [vmem:[#allocation5 + $0x200] sm:$0xff]  ;;  %v165_v51 = vld [vmem:[#allocation5 + $0x310] sm:$0xff]  ;;  %v64_v52 = vld [vmem:[#allocation2 + $0x20] sm:$0xff] }
  0x4c   :  { %653 = vmatprep.subr.mxu0 %v160_v8  ;;  %720 = vmatprep.subr.mxu1 %v887_v11  ;;  %v164_v53 = vld [vmem:[#allocation5 + $0x308] sm:$0xff]  ;;  %v163_v54 = vld [vmem:[#allocation5 + $0x300] sm:$0xff]  ;;  %v66_v55 = vld [vmem:[#allocation2 + $0x30] sm:$0xff] }
  0x4d   :  { %654 = vmatpush3.msra.mxu0 %v144_v10  ;;  %721 = vmatpush3.msra.mxu1 %v177_v13  ;;  %v482_v56 = vld [vmem:[#allocation7 + $0x78] sm:$0xff]  ;;  %v481_v57 = vld [vmem:[#allocation7 + $0x70] sm:$0xff]  ;;  %v480_v58 = vld [vmem:[#allocation7 + $0x68] sm:$0xff] }
  0x4e   :  { %655 = vmatprep.subr.mxu0 %v159_v12  ;;  %722 = vmatprep.subr.mxu1 %v887_v11  ;;  %v479_v59 = vld [vmem:[#allocation7 + $0x60] sm:$0xff]  ;;  %v478_v60 = vld [vmem:[#allocation7 + $0x58] sm:$0xff]  ;;  %v477_v61 = vld [vmem:[#allocation7 + $0x50] sm:$0xff] }
  0x4f   :  { %656 = vmatpush3.msra.mxu0 %v143_v14  ;;  %723 = vmatpush3.msra.mxu1 %v176_v16  ;;  %v476_v62 = vld [vmem:[#allocation7 + $0x48] sm:$0xff]  ;;  %v475_v63 = vld [vmem:[#allocation7 + $0x40] sm:$0xff]  ;;  %v474_v0 = vld [vmem:[#allocation7 + $0x38] sm:$0xff] }
  0x50   :  { %657 = vmatprep.subr.mxu0 %v158_v15  ;;  %724 = vmatprep.subr.mxu1 %v887_v11  ;;  %v473_v1 = vld [vmem:[#allocation7 + $0x30] sm:$0xff]  ;;  %v472_v2 = vld [vmem:[#allocation7 + $0x28] sm:$0xff]  ;;  %v471_v3 = vld [vmem:[#allocation7 + $0x20] sm:$0xff] }
  0x51   :  { %658 = vmatpush3.msra.mxu0 %v142_v17  ;;  %725 = vmatpush3.msra.mxu1 %v175_v19  ;;  %v470_v4 = vld [vmem:[#allocation7 + $0x18] sm:$0xff]  ;;  %v469_v5 = vld [vmem:[#allocation7 + $0x10] sm:$0xff]  ;;  %v468_v6 = vld [vmem:[#allocation7 + $0x8] sm:$0xff] }
  0x52   :  { %659 = vmatprep.subr.mxu0 %v157_v18  ;;  %726 = vmatprep.subr.mxu1 %v887_v11  ;;  %v467_v7 = vld [vmem:[#allocation7] sm:$0xff]  ;;  %v577_v13 = vld [vmem:[%s974_s2] ss:$0 sm:$0xff]  ;;  %s856_s2 = scalar_lea.vmem %s568_s12, 128 }
  0x53   :  { %660 = vmatpush3.msra.mxu0 %v141_v20  ;;  %727 = vmatpush3.msra.mxu1 %v174_v22  ;;  %p857_p1 = scmp.ne.s32.totalorder %s568_s12, %s856_s2  ;;  %p862_p3 = scmp.lt.s32.totalorder %s856_s2, %s856_s2 }
  0x54   :  { %661 = vmatprep.subr.mxu0 %v156_v21  ;;  %728 = vmatprep.subr.mxu1 %v887_v11 }
  0x55   :  { %662 = vmatpush3.msra.mxu0 %v140_v23  ;;  %729 = vmatpush3.msra.mxu1 %v173_v25  ;;  %v578_v25 = vld [vmem:[%s976_s4] ss:$0 sm:$0xff]  ;;  %p863_p4 = por %p862_p3, %p861_p2 }
  0x56   :  { %663 = vmatprep.subr.mxu0 %v155_v24  ;;  %730 = vmatprep.subr.mxu1 %v887_v11 }
  0x57   :  { %664 = vmatpush3.msra.mxu0 %v139_v26  ;;  %731 = vmatpush3.msra.mxu1 %v172_v28  ;;  %p864_p5 = pnand %p863_p4, %p857_p1 }
  0x58   :  { %665 = vmatprep.subr.mxu0 %v154_v27  ;;  %732 = vmatprep.subr.mxu1 %v887_v11 }
  0x59   :  { %666 = vmatpush3.msra.mxu0 %v138_v29  ;;  %733 = vmatpush3.msra.mxu1 %v171_v31 }
  0x5a   :  { %667 = vmatprep.subr.mxu0 %v153_v30  ;;  %734 = vmatprep.subr.mxu1 %v887_v11 }
  0x5b   :  { %668 = vmatpush3.msra.mxu0 %v137_v32  ;;  %735 = vmatpush3.msra.mxu1 %v170_v34 }
  0x5c   :  { %669 = vmatprep.subr.mxu0 %v152_v33  ;;  %736 = vmatprep.subr.mxu1 %v887_v11 }
  0x5d   :  { %670 = vmatpush3.msra.mxu0 %v136_v35  ;;  %737 = vmatpush3.msra.mxu1 %v169_v37 }
  0x5e   :  { %671 = vmatprep.subr.mxu0 %v151_v36  ;;  %738 = vmatprep.subr.mxu1 %v887_v11 }
  0x5f   :  { %672 = vmatpush3.msra.mxu0 %v135_v38  ;;  %739 = vmatpush3.msra.mxu1 %v168_v40 }
  0x60   :  { %673 = vmatprep.subr.mxu0 %v150_v39  ;;  %740 = vmatprep.subr.mxu1 %v887_v11 }
  0x61   :  { %674 = vmatpush3.msra.mxu0 %v134_v41  ;;  %741 = vmatpush3.msra.mxu1 %v167_v43 }
  0x62   :  { %675 = vmatprep.subr.mxu0 %v149_v42  ;;  %742 = vmatprep.subr.mxu1 %v887_v11 }
  0x63   :  { %676 = vmatpush3.msra.mxu0 %v133_v44  ;;  %743 = vmatpush3.msra.mxu1 %v166_v46 }
  0x64   :  { %677 = vmatprep.subr.mxu0 %v148_v45  ;;  %744 = vmatprep.subr.mxu1 %v887_v11 }
  0x65   :  { %678 = vmatpush3.msra.mxu0 %v132_v47  ;;  %390 = vmatprep.mubr.f32.mxu0 %v65_v49 }
  0x66   :  { %679 = vmatprep.subr.mxu0 %v147_v48  ;;  %745 = vmatpush3.msra.mxu1 %v165_v51 }
  0x67   :  { %680 = vmatpush3.msra.mxu0 %v131_v50  ;;  %746 = vmatprep.subr.mxu1 %v887_v11 }
  0x68   :  { %391 = vmatmul.mubr.f32.vlgmr.msra.gmra.mxu0 %v64_v52  ;;  %747 = vmatpush3.msra.mxu1 %v164_v53 }
  0x69   :  { %750 = vmatprep.mubr.msk.f32.mxu1 %vm888_vm0, %v887_v11  ;;  %748 = vmatprep.subr.mxu1 %v887_v11 }
  0x6a   :  { %753 = vmatprep.subr.mxu0 %v887_v11  ;;  %749 = vmatpush3.msra.mxu1 %v163_v54 }
  0x6b   :  { %785 = vmatprep.mubr.msk.f32.mxu0 %vm888_vm0, %v887_v11  ;;  %751 = vmatmul.mubr.f32.vlgmr.msra.gmra.mxu1 %v66_v55 }
  0x6c   :  { %754 = vmatpush3.msra.mxu0 %v482_v56 }
  0x6d   :  { %755 = vmatprep.subr.mxu0 %v887_v11 }
  0x6e   :  { %756 = vmatpush3.msra.mxu0 %v481_v57 }
  0x6f   :  { %757 = vmatprep.subr.mxu0 %v887_v11 }
  0x70   :  { %758 = vmatpush3.msra.mxu0 %v480_v58 }
  0x71   :  { %759 = vmatprep.subr.mxu0 %v887_v11 }
  0x72   :  { %760 = vmatpush3.msra.mxu0 %v479_v59 }
  0x73   :  { %761 = vmatprep.subr.mxu0 %v887_v11 }
  0x74   :  { %762 = vmatpush3.msra.mxu0 %v478_v60 }
  0x75   :  { %763 = vmatprep.subr.mxu0 %v887_v11 }
  0x76   :  { %764 = vmatpush3.msra.mxu0 %v477_v61 }
  0x77   :  { %765 = vmatprep.subr.mxu0 %v887_v11 }
  0x78   :  { %766 = vmatpush3.msra.mxu0 %v476_v62 }
  0x79   :  { %767 = vmatprep.subr.mxu0 %v887_v11 }
  0x7a   :  { %768 = vmatpush3.msra.mxu0 %v475_v63 }
  0x7b   :  { %769 = vmatprep.subr.mxu0 %v887_v11 }
  0x7c   :  { %770 = vmatpush3.msra.mxu0 %v474_v0 }
  0x7d   :  { %771 = vmatprep.subr.mxu0 %v887_v11 }
  0x7e   :  { %772 = vmatpush3.msra.mxu0 %v473_v1 }
  0x7f   :  { %773 = vmatprep.subr.mxu0 %v887_v11 }
  0x80   :  { %774 = vmatpush3.msra.mxu0 %v472_v2 }
  0x81   :  { %775 = vmatprep.subr.mxu0 %v887_v11 }
  0x82   :  { %776 = vmatpush3.msra.mxu0 %v471_v3 }
  0x83   :  { %777 = vmatprep.subr.mxu0 %v887_v11 }
  0x84   :  { %778 = vmatpush3.msra.mxu0 %v470_v4 }
  0x85   :  { %779 = vmatprep.subr.mxu0 %v887_v11 }
  0x86   :  { %780 = vmatpush3.msra.mxu0 %v469_v5 }
  0x87   :  { %781 = vmatprep.subr.mxu0 %v887_v11 }
  0x88   :  { %782 = vmatpush3.msra.mxu0 %v468_v6 }
  0x89   :  { %783 = vmatprep.subr.mxu0 %v887_v11 }
  0x8a   :  { %784 = vmatpush3.msra.mxu0 %v467_v7 }
 0x106   :  { %v611_v8 = vpop.f32.mrf.mxu0 }
 0x108   :  { %v612_v9 = vpop.f32.mrf.mxu0 }
 0x109   :  { %v646_v10 = vpop.f32.mrf.mxu1  ;;  %v613_v12 = vadd.f32 %v612_v9, %v611_v8 }
 0x10b   :  { %v647_v14 = vpop.f32.mrf.mxu1  ;;  %v253_v15 = vadd.f32 %v613_v12, %v577_v13 }
 0x10c   :  { %v648_v16 = vadd.f32 %v647_v14, %v646_v10 }
 0x10e   :  { %v323_v19 = vadd.f32 %v648_v16, %v253_v15 }
 0x128   :  { %v681_v17 = vpop.f32.mrf.mxu0 }
 0x12a   :  { %v682_v18 = vpop.f32.mrf.mxu0 }
 0x12b   :  { %v683_v20 = vadd.f32 %v682_v18, %v681_v17  ;;  %v462_v21 = vpop.f32.mrf.mxu1 }
 0x12d   :  { %v393_v22 = vadd.f32 %v683_v20, %v323_v19  ;;  %v752_v11 = vpop.f32.mrf.mxu1 }
 0x12f   :  { %v463_v23 = vadd.f32 %v462_v21, %v393_v22 }
 0x131   :  { %v466_v24 = vmax.f32 %v463_v23, 0.0 }
 0x133   :  { %786 = vmatmul.mubr.f32.vlgmr.msra.gmra.mxu0 %v466_v24 }
 0x1f3   :  { %v556_v26 = vpop.f32.mrf.mxu0 }
 0x1f4   :  { %v557_v27 = vadd.f32 %v578_v25, %v556_v26 }
 0x1f5   :  { %v787_v28 = vpop.f32.mrf.mxu0 }
 0x1f6   :  { %560 = vst [vmem:[#allocation8] sm:$0xff] %v557_v27 }
 0x1f7   :  { %867 = shalt.err (!%p864_p5)
}
 0x1f8   :  { %570 = dma.vmem_to_hbm [thread:$0]  %s568_s12, 128, %s977_s5, [#allocation4]  }
 0x1f9   :  { %880 = dma.done.wait [#allocation4], 128  }
 0x1fa   :  { %881 = vsyncadd [#allocation4], 4294967168 }
 0x1fb   :  { %574 = vsyncpa [#allocation3], 1 }
 0x1fc   :  { %575 = vsyncpa [#allocation6], 1 }
 0x1fd   :  { %576 = vsyncpa [#allocation4], 1 }

</bundles_post_ra>
